<compile_context>
chip_gen: v7x
topology: tpu7x:2x2x1
jax: 0.10.0
libtpu: 0.0.40
codegen_flags: <defaults>
</compile_context>

<pallas_src>
import functools
import math

import jax
import jax.numpy as jnp
from jax.experimental import pallas as pl
from jax.experimental.pallas import tpu as pltpu


def _round_up(x, m):
    return (x + m - 1) // m * m


def _pick_tile(dim, pref, align):
    # Largest "nice" tile not exceeding the (alignment-rounded) dimension.
    return min(pref, _round_up(dim, align))


# ----------------------------------------------------------------------------
# Kernel 1: tiled matmul with f32 VMEM accumulator (one propagation hop)
# ----------------------------------------------------------------------------
def _matmul_kernel(a_ref, b_ref, o_ref, acc_ref):
    @pl.when(pl.program_id(2) == 0)
    def _():
        acc_ref[...] = jnp.zeros_like(acc_ref)

    acc_ref[...] += jnp.dot(a_ref[...], b_ref[...],
                            preferred_element_type=jnp.float32)

    @pl.when(pl.program_id(2) == pl.num_programs(2) - 1)
    def _():
        o_ref[...] = acc_ref[...].astype(o_ref.dtype)


def _matmul_padded(a, b, *, tm, tn, tk, out_dtype):
    """a: (Mp, Kp), b: (Kp, Np) already padded to tile multiples."""
    Mp, Kp = a.shape
    _, Np = b.shape
    grid = (Mp // tm, Np // tn, Kp // tk)
    in_bytes = (Mp * Kp + Kp * Np) * jnp.dtype(a.dtype).itemsize
    out_bytes = Mp * Np * jnp.dtype(out_dtype).itemsize
    cost = pl.CostEstimate(flops=2 * Mp * Np * Kp, transcendentals=0,
                           bytes_accessed=in_bytes + out_bytes)
    return pl.pallas_call(
        _matmul_kernel,
        out_shape=jax.ShapeDtypeStruct((Mp, Np), out_dtype),
        grid_spec=pltpu.PrefetchScalarGridSpec(
            num_scalar_prefetch=0,
            grid=grid,
            in_specs=[
                pl.BlockSpec((tm, tk), lambda i, j, k: (i, k)),
                pl.BlockSpec((tk, tn), lambda i, j, k: (k, j)),
            ],
            out_specs=pl.BlockSpec((tm, tn), lambda i, j, k: (i, j)),
            scratch_shapes=[pltpu.VMEM((tm, tn), jnp.float32)],
        ),
        compiler_params=pltpu.CompilerParams(
            dimension_semantics=("parallel", "parallel", "arbitrary"),
        ),
        cost_estimate=cost,
    )(a, b)


def propagate(adj, x, K=2, *, compute_dtype=jnp.bfloat16,
              tm_pref=256, tn_pref=256, tk_pref=512):
    """processed_x = adj^K @ x  via K tiled matmul pallas_calls."""
    # TODO(synk): torch.spmm uses a sparse adjacency; no sparse-format Pallas
    # analog, so the adjacency is consumed as a dense (tiled) matrix.
    N, F = x.shape
    tm = _pick_tile(N, tm_pref, 8)      # row tile of adj / output
    tk = _pick_tile(N, tk_pref, 128)    # reduction tile over nodes
    tn = _pick_tile(F, tn_pref, 128)    # feature tile
    Np = _round_up(N, math.lcm(tm, tk))  # N is both a row and a reduction dim
    Fp = _round_up(F, tn)

    adj_p = jnp.pad(adj, ((0, Np - N), (0, Np - N))).astype(compute_dtype)
    h = jnp.pad(x, ((0, Np - N), (0, Fp - F))).astype(compute_dtype)
    for step in range(K):
        last = step == K - 1
        h = _matmul_padded(adj_p, h, tm=tm, tn=tn, tk=tk,
                           out_dtype=jnp.float32 if last else compute_dtype)
    return h[:N, :F]


# ----------------------------------------------------------------------------
# Kernel 2: fused row-tiled linear + log_softmax (lane-dense padded classes)
# ----------------------------------------------------------------------------
def _fc_logsoftmax_kernel(x_ref, wt_ref, b_ref, o_ref, *, valid_c):
    logits = jnp.dot(x_ref[...], wt_ref[...],
                     preferred_element_type=jnp.float32) + b_ref[...]
    # Exclude padded class columns from max / sum-exp (keeps denom correct).
    col = jax.lax.broadcasted_iota(jnp.int32, logits.shape, 1)
    logits = jnp.where(col < valid_c, logits, jnp.float32(-1e30))
    m = jnp.max(logits, axis=-1, keepdims=True)
    shifted = logits - m
    lse = jnp.log(jnp.sum(jnp.exp(shifted), axis=-1, keepdims=True))
    o_ref[...] = (shifted - lse).astype(o_ref.dtype)


def fc_logsoftmax(x, w, b, *, tm_pref=256):
    # x: (N, F) f32, w: (C, F) torch-Linear layout, b: (C,)
    N, F = x.shape
    C = w.shape[0]
    tm = _pick_tile(N, tm_pref, 8)
    Np = _round_up(N, tm)
    Fp = _round_up(F, 128)   # lane-dense activation loads
    Cp = _round_up(C, 128)   # lane-dense output stores (biggest single lever)
    # TODO(synk): F (nfeat) is kept un-split here; add a reduction grid axis
    # if feature width ever exceeds a few thousand.

    x_p = jnp.pad(x, ((0, Np - N), (0, Fp - F)))
    wt_p = jnp.pad(w.T, ((0, Fp - F), (0, Cp - C)))
    b_p = jnp.pad(b, (0, Cp - C)).reshape(1, Cp)

    cost = pl.CostEstimate(
        flops=2 * Np * Fp * Cp + 5 * Np * Cp,
        transcendentals=Np * Cp + Np,
        bytes_accessed=(Np * Fp + Fp * Cp + Cp + Np * Cp) * 4,
    )
    out = pl.pallas_call(
        functools.partial(_fc_logsoftmax_kernel, valid_c=C),
        out_shape=jax.ShapeDtypeStruct((Np, Cp), jnp.float32),
        grid_spec=pltpu.PrefetchScalarGridSpec(
            num_scalar_prefetch=0,
            grid=(Np // tm,),
            in_specs=[
                pl.BlockSpec((tm, Fp), lambda i: (i, 0)),
                pl.BlockSpec((Fp, Cp), lambda i: (0, 0)),
                pl.BlockSpec((1, Cp), lambda i: (0, 0)),
            ],
            out_specs=pl.BlockSpec((tm, Cp), lambda i: (i, 0)),
        ),
        compiler_params=pltpu.CompilerParams(
            dimension_semantics=("parallel",),
        ),
        cost_estimate=cost,
    )(x_p, wt_p, b_p)
    return out[:N, :C]


# ----------------------------------------------------------------------------
# SGC "module": deterministic init + forward
# ----------------------------------------------------------------------------
class SGC:
    def __init__(self, adj, features, num_classes, K=2,
                 compute_dtype=jnp.bfloat16):
        N, nfeat = features.shape
        key = jax.random.PRNGKey(0)
        kw, kb = jax.random.split(key)
        # nn.Linear default init: U(-1/sqrt(fan_in), 1/sqrt(fan_in))
        bound = 1.0 / jnp.sqrt(jnp.float32(nfeat))
        self.weight = jax.random.uniform(kw, (num_classes, nfeat),
                                         jnp.float32, -bound, bound)
        self.bias = jax.random.uniform(kb, (num_classes,),
                                       jnp.float32, -bound, bound)
        # Pre-propagate features (K tiled-matmul Pallas kernels).
        self.processed_x = propagate(adj, features, K=K,
                                     compute_dtype=compute_dtype)

    def forward(self):
        return fc_logsoftmax(self.processed_x, self.weight, self.bias)


if __name__ == "__main__":
    # Small synthetic graph: N nodes, nfeat features, nclass classes.
    N, nfeat, nclass, K = 16, 32, 8, 2

    key = jax.random.PRNGKey(0)
    k_adj, k_x = jax.random.split(key)

    # Dense row-normalized "adjacency" (stands in for the sparse adj).
    raw = jax.random.uniform(k_adj, (N, N), jnp.float32)
    adj = raw / jnp.sum(raw, axis=1, keepdims=True)
    features = jax.random.normal(k_x, (N, nfeat), jnp.float32)

    model = SGC(adj, features, nclass, K=K)
    out = model.forward()
    out = jax.block_until_ready(out)

    # Reference in plain JAX, mirroring the kernel's bf16-input / f32-accum
    # propagation so tolerances stay tight (MXU default-precision f32 matmul
    # in the fc step still differs slightly -> relaxed tolerance).
    adj_bf = adj.astype(jnp.bfloat16)
    px = features
    for _ in range(K):
        px = jnp.dot(adj_bf, px.astype(jnp.bfloat16),
                     preferred_element_type=jnp.float32)
    logits = px @ model.weight.T + model.bias
    ref = jax.nn.log_softmax(logits, axis=1)

    assert out.shape == (N, nclass)
    assert bool(jnp.all(jnp.isfinite(out)))
    assert jnp.allclose(out, ref, atol=1e-2, rtol=1e-2)

    print("KERNEL_OK")
</pallas_src>

<mosaic_0001>
module attributes {stable_mosaic.version = 11 : i64} {
  func.func @_matmul_kernel(%arg0: i32, %arg1: i32, %arg2: i32, %arg3: memref<16x128xbf16, #tpu.memory_space<vmem>>, %arg4: memref<128x128xbf16, #tpu.memory_space<vmem>>, %arg5: memref<16x128xbf16, #tpu.memory_space<vmem>>, %arg6: memref<16x128xf32, #tpu.memory_space<vmem>>) attributes {dimension_semantics = [#tpu.dimension_semantics<parallel>, #tpu.dimension_semantics<parallel>, #tpu.dimension_semantics<arbitrary>], iteration_bounds = array<i64: 8, 1, 1>, scalar_prefetch = 0 : i64, scratch_operands = 1 : i64, tpu.core_type = #tpu.core_type<tc>, window_params = [{transform_indices = @transform_0, window_bounds = array<i64: 16, 128>}, {transform_indices = @transform_1, window_bounds = array<i64: 128, 128>}, {transform_indices = @transform_2, window_bounds = array<i64: 16, 128>}]} {
    %c0_i32 = arith.constant 0 : i32
    %0 = arith.cmpi eq, %arg2, %c0_i32 : i32
    %1 = arith.extui %0 : i1 to i32
    %c0_i32_0 = arith.constant 0 : i32
    %2 = arith.cmpi ne, %1, %c0_i32_0 : i32
    scf.if %2 {
      %cst_10 = arith.constant 0.000000e+00 : f32
      %12 = vector.broadcast %cst_10 : f32 to vector<16x128xf32>
      %c0_11 = arith.constant 0 : index
      %c0_12 = arith.constant 0 : index
      %13 = vector.load %arg6[%c0_11, %c0_12] : memref<16x128xf32, #tpu.memory_space<vmem>>, vector<16x128xf32>
      tpu.vector_store %arg6[%c0_11, %c0_12], %12 {strides = array<i32>} : memref<16x128xf32, #tpu.memory_space<vmem>>, vector<16x128xf32>,
    } else {
    }
    %c0 = arith.constant 0 : index
    %c0_1 = arith.constant 0 : index
    %3 = vector.load %arg6[%c0, %c0_1] : memref<16x128xf32, #tpu.memory_space<vmem>>, vector<16x128xf32>
    %c0_2 = arith.constant 0 : index
    %c0_3 = arith.constant 0 : index
    %4 = vector.load %arg3[%c0_2, %c0_3] : memref<16x128xbf16, #tpu.memory_space<vmem>>, vector<16x128xbf16>
    %c0_4 = arith.constant 0 : index
    %c0_5 = arith.constant 0 : index
    %5 = vector.load %arg4[%c0_4, %c0_5] : memref<128x128xbf16, #tpu.memory_space<vmem>>, vector<128x128xbf16>
    %cst = arith.constant dense<0.000000e+00> : vector<16x128xf32>
    %6 = tpu.matmul %4, %5, %cst {dimension_numbers = #tpu.dot_dimension_numbers<[1], [0], [0], [1], [0, 0, 1, 1], [], []>} : vector<16x128xbf16>, vector<128x128xbf16>, vector<16x128xf32> -> vector<16x128xf32>
    %7 = arith.addf %3, %6 : vector<16x128xf32>
    %c0_6 = arith.constant 0 : index
    %c0_7 = arith.constant 0 : index
    %8 = vector.load %arg6[%c0_6, %c0_7] : memref<16x128xf32, #tpu.memory_space<vmem>>, vector<16x128xf32>
    tpu.vector_store %arg6[%c0_6, %c0_7], %7 {strides = array<i32>} : memref<16x128xf32, #tpu.memory_space<vmem>>, vector<16x128xf32>,
    %c0_i32_8 = arith.constant 0 : i32
    %9 = arith.cmpi eq, %arg2, %c0_i32_8 : i32
    %10 = arith.extui %9 : i1 to i32
    %c0_i32_9 = arith.constant 0 : i32
    %11 = arith.cmpi ne, %10, %c0_i32_9 : i32
    scf.if %11 {
      %c0_10 = arith.constant 0 : index
      %c0_11 = arith.constant 0 : index
      %12 = vector.load %arg6[%c0_10, %c0_11] : memref<16x128xf32, #tpu.memory_space<vmem>>, vector<16x128xf32>
      %13 = arith.truncf %12 : vector<16x128xf32> to vector<16x128xbf16>
      %c0_12 = arith.constant 0 : index
      %c0_13 = arith.constant 0 : index
      %14 = vector.load %arg5[%c0_12, %c0_13] : memref<16x128xbf16, #tpu.memory_space<vmem>>, vector<16x128xbf16>
      tpu.vector_store %arg5[%c0_12, %c0_13], %13 {strides = array<i32>} : memref<16x128xbf16, #tpu.memory_space<vmem>>, vector<16x128xbf16>,
    } else {
    }
    return
  }
  func.func @transform_0(%arg0: i32, %arg1: i32, %arg2: i32) -> (i32, i32) {
    %c0_i32 = arith.constant 0 : i32
    return %arg0, %arg2 : i32, i32
  }
  func.func @transform_1(%arg0: i32, %arg1: i32, %arg2: i32) -> (i32, i32) {
    %c0_i32 = arith.constant 0 : i32
    return %arg2, %arg1 : i32, i32
  }
  func.func @transform_2(%arg0: i32, %arg1: i32, %arg2: i32) -> (i32, i32) {
    %c0_i32 = arith.constant 0 : i32
    return %arg0, %arg1 : i32, i32
  }
}

</mosaic_0001>

<bundles_post_ra>
// kernel: tpu_custom_call.1
= control target key start
LH: loop header
LB: loop body
LE: loop exit
PB: predicated region body
PF: predicated region fallthrough
CT: control target
= control target key end

     0   :  { %7 = vsyncpa [#allocation4], 0  ;;  %s1027_s0 = inlined_call_operand.hbm [shape: bf16[128,128], index: 0, kind: input, shape index: {}]   ;;  %s1028_s1 = inlined_call_operand.hbm [shape: bf16[128,128], index: 1, kind: input, shape index: {}]   ;;  %s1029_s2 = inlined_call_operand.hbm [shape: bf16[128,128], index: 2, kind: output, shape index: {}]  }
   0x1   :  { %9 = vsyncpa [#allocation4 + $0x1], 0 }
   0x2   :  { %10 = vsyncpa [#allocation7], 0 }
   0x3   :  { %11 = vsyncpa [#allocation5], 0 }
   0x4   :  { %13 = vsyncpa [#allocation5 + $0x1], 0  ;;  %s797_s9 = smov 0   ;;  %s799_s10 = smov 0  }
   0x5   :  { %s801_s11 = smov 0   ;;  %s803_s12 = smov 0  }
   0x6   :  { %s805_s13 = smov 0   ;;  %s807_s14 = smov 0  }
   0x7 LB: > { %s473_s15 = sadd.s32 4294967295, %s771_s14   ;;  %s474_s16 = sadd.s32 4294967294, %s771_s14   ;;  %s771_s14 = sphi %s807_s14, %s19_s14   ;;  %s767_s13 = sphi %s805_s13, %s1052_s13   ;;  %s763_s12 = sphi %s803_s12, %s1051_s12   ;;  %s759_s11 = sphi %s801_s11, %s1050_s11   ;;  %s755_s10 = sphi %s799_s10, %s1049_s10   ;;  %s751_s9 = sphi %s797_s9, %s1048_s9  }
   0x8   : > { %p60_p0 = scmp.ne.s32.totalorder %s755_s10, %s751_s9  ;;  %p831_p1 = scmp.eq.s32.totalorder %s473_s15, 0 }
   0x9   : > { %p835_p2 = scmp.eq.s32.totalorder %s473_s15, 7  ;;  %p120_p3 = scmp.eq.s32.totalorder %s474_s16, 7 }
   0xa   : > { %s1034_s17 = scalar_select %p831_p1, 1, 0 }
   0xb   : > { %s1035_s18 = scalar_select %p835_p2, 1, 0 }
   0xc   : > { %p841_p4 = por %p831_p1, %p60_p0  ;;  %p475_p5 = scmp.ge.s32.totalorder %s771_s14, 1 }
   0xd   : > { %p846_p6 = por %p120_p3, %p60_p0  ;;  %p127_p7 = scmp.lt.s32.totalorder %s771_s14, 9 }
   0xe   : > { %s1036_s19 = scalar_select %p841_p4, 1, 0 }
   0xf   : > { %s1037_s20 = scalar_select %p846_p6, 1, 0 }
  0x10   : > { %p851_p8 = pnand %p475_p5, %p127_p7  ;;  %s773_s22 = smov [#allocation6]  }
  0x11   : > { %s143_s23 = sshll.u32 %s773_s22, 4  ;;  %s38_s25 = sadd.s32 1, %s767_s13  ;;  %s144_s23 = int_to_ptr.vmem [resolvable:$true] %s143_s23 }
  0x12   : > { %s1038_s21 = scalar_select %p851_p8, 1, 0 }
  0x13   : > { %p547_p9 = pneg %p851_p8  ;;  %s627_s28 = scalar_lea.hbm %s1028_s1, 1024 }
  0x14   : > { %p628_p11 = scmp.ne.s32.totalorder %s1028_s1, %s627_s28  ;;  %p634_p3 = scmp.lt.u32.totalorder %s627_s28, %s1028_s1 }
  0x15   : > { %p859_p10 = pnand %p547_p9, %p831_p1 }
  0x17   : > { %p629_p12 = pneg %p859_p10 }
  0x19   : > { %p630_p13 = pnand %p629_p12, %p628_p11 }
  0x1b   : > { %p631_p0 = pneg %p630_p13 }
  0x1d   : > { %p636_p5 = pnand %p634_p3, %p631_p0 }
  0x1f   : > { %639 = shalt.err (!%p636_p5)
}
  0x20   : > { %s640_s5 = scalar_lea.vmem %s144_s23, 1024  ;;  %p648_p1 = scmp.lt.s32.totalorder %s144_s23, %s144_s23 }
  0x21   : > { %p641_p7 = scmp.ne.s32.totalorder %s144_s23, %s640_s5  ;;  %p649_p4 = scmp.lt.s32.totalorder %s640_s5, %s640_s5 }
  0x23   : > { %p643_p9 = pnand %p641_p7, %p629_p12  ;;  %p650_p8 = por %p649_p4, %p648_p1 }
  0x25   : > { %p644_p6 = pneg %p643_p9 }
  0x27   : > { %p651_p2 = pnand %p650_p8, %p644_p6 }
  0x29   : > { %654 = shalt.err (!%p651_p2)
}
  0x2a   : > { %s774_s6 = smov 64   ;;  %s775_s7 = smov 4  }
  0x2b   : > { %550 = dma.hbm_to_vmem [thread:$0]  (!%p859_p10), %s1028_s1, 1024, %s144_s23, [#allocation7], %s774_s6, %s774_s6, %s775_s7  }
  0x2c   : > { %p40_p1 = scmp.ge.s32.totalorder %s38_s25, 8  ;;  %s47_s16 = sadd.s32 1, %s759_s11 }
  0x2d   : > { %p54_p2 = scmp.ne.s32.totalorder %s759_s11, %s755_s10  ;;  %p55_p4 = scmp.eq.s32.totalorder %s771_s14, 0 }
  0x2e   : > { %s1054_s25 = smov (%p40_p1, %s38_s25), 0  ;;  %p1041_p8 = scmp.ne.s32.totalorder %s1035_s18, 0 }
  0x2f   : > { %p889_p6 = por %p55_p4, %p54_p2  ;;  %s42_s26 = ssub.s32 %s767_s13, %s1054_s25 }
  0x30   : > { %p895_p11 = por %p1041_p8, %p54_p2  ;;  %p560_p12 = scmp.lt.s32.totalorder %s771_s14, 8 }
  0x31   : > { %p45_p10 = scmp.eq.s32.totalorder %s42_s26, 0  ;;  %s157_s23 = sand.u32 1, %s759_s11  }
  0x32   : > { %s478_s27 = sshll.u32 %s157_s23, 3  ;;  %s501_s29 = sshll.u32 %s767_s13, 7 }
  0x33   : > { %s904_s28 = scalar_select %p45_p10, %s759_s11, %s47_s16  }
  0x34   : > { %s910_s4 = scalar_lea.hbm %s1027_s0, %s501_s29  ;;  %s161_s18 = scalar_lea.vmem [#allocation3], %s478_s27 }
  0x35   : > { %s169_s5 = sshll.u32 %s161_s18, 4  ;;  %p916_p13 = pnand %p560_p12, %p889_p6  ;;  %s912_s5 = int_to_ptr.vmem [resolvable:$true] %s169_s5 }
  0x36   : > { %s920_s15 = scalar_lea.sflag [#allocation4], %s157_s23  ;;  %s655_s16 = scalar_lea.hbm %s910_s4, 128 }
  0x37   : > { %p656_p0 = scmp.ne.s32.totalorder %s910_s4, %s655_s16  ;;  %p657_p3 = pneg %p916_p13 }
  0x38   : > { %s660_s22 = scalar_lea.hbm %s1027_s0, 1024  ;;  %p661_p9 = scmp.lt.u32.totalorder %s910_s4, %s1027_s0 }
  0x39   : > { %p658_p5 = pnand %p657_p3, %p656_p0  ;;  %p662_p1 = scmp.lt.u32.totalorder %s660_s22, %s655_s16 }
  0x3a   : > { %p664_p4 = scmp.lt.u32.totalorder %s655_s16, %s910_s4 }
  0x3b   : > { %p659_p7 = pneg %p658_p5  ;;  %p663_p2 = por %p662_p1, %p661_p9 }
  0x3d   : > { %p665_p6 = por %p664_p4, %p663_p2 }
  0x3f   : > { %p666_p8 = pnand %p665_p6, %p659_p7 }
  0x41   : > { %669 = shalt.err (!%p666_p8)
}
  0x42   : > { %s670_s23 = scalar_lea.vmem %s912_s5, 128  ;;  %s776_s3 = smov [#allocation3]  }
  0x43   : > { %p671_p12 = scmp.ne.s32.totalorder %s912_s5, %s670_s23  ;;  %s675_s18 = sshll.u32 %s776_s3, 4  ;;  %s676_s18 = int_to_ptr.vmem [resolvable:$false] %s675_s18 }
  0x44   : > { %s677_s26 = scalar_lea.vmem %s676_s18, 256  ;;  %p678_p5 = scmp.lt.s32.totalorder %s912_s5, %s676_s18 }
  0x45   : > { %p673_p10 = pnand %p671_p12, %p657_p3  ;;  %p679_p9 = scmp.lt.s32.totalorder %s677_s26, %s670_s23 }
  0x47   : > { %p674_p0 = pneg %p673_p10  ;;  %p680_p1 = por %p679_p9, %p678_p5 }
  0x49   : > { %p681_p2 = pnand %p680_p1, %p674_p0 }
  0x4b   : > { %684 = shalt.err (!%p681_p2)
}
  0x4c   : > { %554 = dma.hbm_to_vmem [thread:$0]  (!%p916_p13), %s910_s4, 128, %s912_s5, %s920_s15, %s774_s6, %s774_s6, %s775_s7  }
  0x4d   : > { %p1044_p3 = scmp.ne.s32.totalorder %s1038_s21, 0 }
  0x4e   : > { %s954_s16 = sand.u32 (!%p1044_p3), 1, %s755_s10   ;;  %p1045_p7 = scmp.ne.s32.totalorder (!%p1044_p3), %s1036_s19, 0 }
  0x4f   : > { %181 = sbr.rel (%p1044_p3) target bundleno = 354 (0x162), region = 28  ;;  %s482_s27 = sshll.u32 (!%p1044_p3), %s954_s16, 3 }
  0x50   : > { %s184_s22 = scalar_lea.sflag (!%p1044_p3), [#allocation4], %s954_s16  ;;  %s960_s8 = scalar_lea.vmem (!%p1044_p3), [#allocation3], %s482_s27 }
  0x56   : > { %738 = dma.done.wait (%p1045_p7), %s184_s22, 128  }
  0x57   : > { %740 = vsyncadd (%p1045_p7), %s184_s22, 4294967168  ;;  %p1046_p13 = scmp.ne.s32.totalorder %s1034_s17, 0 }
  0x59   : > { %742 = dma.done.wait (%p1046_p13), [#allocation7], 1024  }
  0x5a   : > { %744 = vsyncadd (%p1046_p13), [#allocation7], 4294966272  ;;  %v777_v0 = vmov 0.0   ;;  %vm778_vm0 = vmmov 0   ;;  %v618_v1 = vld [vmem:[#allocation6] sm:$0xff]   ;;  %v619_v2 = vld [vmem:[#allocation6 + $0x8] sm:$0xff]  }
  0x5b   : > { %519 = vmatprep.subr.bf16.mxu0 %v777_v0  ;;  %535 = vmatprep.mubr.msk.bf16.mxu0 %vm778_vm0, %v777_v0  ;;  %v620_v3 = vld [vmem:[#allocation6 + $0x10] sm:$0xff]   ;;  %v621_v4 = vld [vmem:[#allocation6 + $0x18] sm:$0xff]   ;;  %v622_v5 = vld [vmem:[#allocation6 + $0x20] sm:$0xff]   ;;  %s211_s17 = scalar_lea.vmem [#allocation8], %s482_s27  ;;  %s504_s21 = sshll.u32 %s763_s12, 7 }
  0x5c   : > { %520 = vmatpush3.bf16.msra.mxu0 %v618_v1  ;;  %v623_v6 = vld [vmem:[#allocation6 + $0x28] sm:$0xff]   ;;  %v624_v7 = vld [vmem:[#allocation6 + $0x30] sm:$0xff]   ;;  %v625_v8 = vld [vmem:[#allocation6 + $0x38] sm:$0xff]   ;;  %s371_s19 = sshll.u32 %s211_s17, 4  ;;  %s979_s4 = scalar_lea.hbm %s1029_s2, %s504_s21  ;;  %s974_s19 = int_to_ptr.vmem [resolvable:$true] %s371_s19 }
  0x5d   : > { %521 = vmatprep.subr.bf16.mxu0 %v777_v0  ;;  %v626_v9 = vld [vmem:[%s960_s8] sm:$0xff]   ;;  %s357_s5 = scalar_lea.sflag [#allocation5], %s954_s16  ;;  %s685_s15 = scalar_lea.vmem %s974_s19, 128 }
  0x5e   : > { %p686_p4 = scmp.ne.s32.totalorder %s974_s19, %s685_s15  ;;  %s779_s12 = smov [#allocation8]  }
  0x5f   : > { %s689_s29 = sshll.u32 %s779_s12, 4  ;;  %s690_s29 = int_to_ptr.vmem [resolvable:$false] %s689_s29 }
  0x60   : > { %522 = vmatpush3.bf16.msra.mxu0 %v619_v2  ;;  %p687_p6 = pnand %p686_p4, %p895_p11  ;;  %s691_s30 = scalar_lea.vmem %s690_s29, 256 }
  0x61   : > { %523 = vmatprep.subr.bf16.mxu0 %v777_v0  ;;  %p692_p12 = scmp.lt.s32.totalorder %s974_s19, %s690_s29  ;;  %p693_p10 = scmp.lt.s32.totalorder %s691_s30, %s685_s15 }
  0x62   : > { %p688_p8 = pneg %p687_p6 }
  0x63   : > { %p694_p0 = por %p693_p10, %p692_p12 }
  0x64   : > { %524 = vmatpush3.bf16.msra.mxu0 %v620_v3 }
  0x65   : > { %525 = vmatprep.subr.bf16.mxu0 %v777_v0  ;;  %p695_p5 = pnand %p694_p0, %p688_p8 }
  0x68   : > { %526 = vmatpush3.bf16.msra.mxu0 %v621_v4 }
  0x69   : > { %527 = vmatprep.subr.bf16.mxu0 %v777_v0 }
  0x6c   : > { %528 = vmatpush3.bf16.msra.mxu0 %v622_v5 }
  0x6d   : > { %529 = vmatprep.subr.bf16.mxu0 %v777_v0 }
  0x70   : > { %530 = vmatpush3.bf16.msra.mxu0 %v623_v6 }
  0x71   : > { %531 = vmatprep.subr.bf16.mxu0 %v777_v0 }
  0x74   : > { %532 = vmatpush3.bf16.msra.mxu0 %v624_v7 }
  0x75   : > { %533 = vmatprep.subr.bf16.mxu0 %v777_v0 }
  0x78   : > { %534 = vmatpush3.bf16.msra.mxu0 %v625_v8 }
  0x7b   : > { %536 = vmatmul.mubr.bf16.vlgmr.msra.gmra.mrb[0].mxu0 %v626_v9 }
 0x14e   : > { %v330_v10 = vpop.f32.mrb[0].mxu0 }
 0x14f   : > { %v537_v11 = vpop.f32.mrb[1].mxu0 }
 0x150   : > { %v333_v12 = vpop.f32.mrb[2].mxu0 }
 0x151   : > { %v508_v13 = vpack.c.bf16 %v333_v12, %v330_v10  ;;  %v538_v14 = vpop.f32.mrb[3].mxu0 }
 0x153   : > { %509 = vst [vmem:[%s211_s17] sm:$0xff] %v508_v13  }
 0x154   : > { %698 = shalt.err (!%p695_p5)
}
 0x155   : > { %s699_s23 = scalar_lea.hbm %s979_s4, 128  ;;  %s703_s26 = scalar_lea.hbm %s1029_s2, 1024 }
 0x156   : > { %p700_p9 = scmp.ne.s32.totalorder %s979_s4, %s699_s23  ;;  %p704_p3 = scmp.lt.u32.totalorder %s979_s4, %s1029_s2 }
 0x157   : > { %p705_p7 = scmp.lt.u32.totalorder %s703_s26, %s699_s23  ;;  %p707_p4 = scmp.lt.u32.totalorder %s699_s23, %s979_s4 }
 0x158   : > { %p701_p1 = pnand %p700_p9, %p895_p11 }
 0x159   : > { %p706_p13 = por %p705_p7, %p704_p3 }
 0x15a   : > { %p702_p2 = pneg %p701_p1 }
 0x15b   : > { %p708_p6 = por %p707_p4, %p706_p13 }
 0x15d   : > { %p709_p8 = pnand %p708_p6, %p702_p2 }
 0x15f   : > { %712 = shalt.err (!%p709_p8)
}
 0x160   : > { %s780_s8 = smov 64   ;;  %s781_s17 = smov 4  }
 0x161   : > { %545 = dma.vmem_to_hbm [thread:$0]  (%p895_p11), %s974_s19, 128, %s979_s4, %s357_s5, %s780_s8, %s780_s8, %s781_s17  }
 0x162 PF: > { %p562_p12 = scmp.ge.s32.totalorder %s771_s14, 2  ;;  %s386_s21 = sand.u32 1, %s751_s9  }
 0x163   : > { %p1047_p10 = scmp.ne.s32.totalorder %s1037_s20, 0  ;;  %s387_s6 = scalar_lea.sflag [#allocation5], %s386_s21 }
 0x165   : > { %p556_p0 = pnand %p562_p12, %p1047_p10 }
 0x167   : > { %746 = dma.done.wait (!%p556_p0), %s387_s6, 128  }
 0x168   : > { %748 = vsyncadd (!%p556_p0), %s387_s6, 4294967168  ;;  %s19_s14 = sadd.s32 1, %s771_s14   ;;  %s1048_s9 = smov %s755_s10 }
 0x169   : > { %p16_p5 = scmp.ge.s32.totalorder %s19_s14, 10   ;;  %s1049_s10 = smov %s759_s11 }
 0x16a   : > { %s1050_s11 = smov %s904_s28  ;;  %s1051_s12 = smov %s767_s13 }
 0x16b   : > { %s1052_s13 = smov %s1054_s25  ;;  %18 = sbr.rel (!%p16_p5) target bundleno = 7 (0x7), region = 86 }
 0x172   :  { %392 = vsyncpa [#allocation4], 1 }
 0x173   :  { %394 = vsyncpa [#allocation4 + $0x1], 1 }
 0x174   :  { %395 = vsyncpa [#allocation7], 1 }
 0x175   :  { %396 = vsyncpa [#allocation5], 1 }
 0x176   :  { %398 = vsyncpa [#allocation5 + $0x1], 1 }

</bundles_post_ra>
